<compile_context>
chip_gen: v6e
topology: v6e:2x2x1
jax: 0.10.0
libtpu: 0.0.40
codegen_flags: <defaults>
</compile_context>

<pallas_src>
import functools

import jax
import jax.numpy as jnp
from jax import lax
from jax.experimental import pallas as pl
from jax.experimental.pallas import tpu as pltpu


# ----------------------------- Pallas kernels -------------------------------

def _convt_fused_kernel(xa_ref, xb_ref, w_ref, b_ref, o_ref, *, k, wp, tm):
    """Fused im2col + GEMM + bias for ConvTranspose2d expressed as a stride-1 conv on
    the dilated/padded input, in flattened-spatial form.

    xa_ref/xb_ref: (C_in, TM)  consecutive tiles of the channel-major flattened padded
                   input; their concat provides the (k-1)*Wp + (k-1) halo for the taps.
    w_ref:         (k*k, C_out, C_in) spatially flipped per-tap weights (resident).
    b_ref:         (C_out, 1) conv bias.
    o_ref:         (C_out, TM) lane-dense output tile (spatial on lanes).
    """
    xw = jnp.concatenate([xa_ref[...], xb_ref[...]], axis=1)       # (C_in, 2*TM)
    c_out = o_ref.shape[0]
    acc = jnp.zeros((c_out, tm), jnp.float32)
    for i in range(k):                                             # static tap loop
        for j in range(k):
            sh = i * wp + j                                        # static lane shift
            xs = xw[:, sh:sh + tm]                                 # (C_in, TM)
            acc = acc + jnp.dot(w_ref[i * k + j], xs,
                                preferred_element_type=jnp.float32)
    o_ref[...] = (acc + b_ref[...]).astype(o_ref.dtype)


def _ln_stats_kernel(y_ref, s_ref, ss_ref):
    # y_ref: (1, C, THW) tile of one sample.  Accumulate sum / sumsq across the HW
    # grid axis into resident output blocks (same block index over axis 1).
    @pl.when(pl.program_id(1) == 0)
    def _():
        s_ref[...] = jnp.zeros_like(s_ref)
        ss_ref[...] = jnp.zeros_like(ss_ref)

    x = y_ref[...].astype(jnp.float32)
    s_ref[...] += jnp.sum(x)
    ss_ref[...] += jnp.sum(x * x)


def _ln_apply_kernel(y_ref, scale_ref, shift_ref, o_ref):
    # out = max(x*scale + shift, 0): one FMA + max per element; mean/rstd/gamma/beta
    # are pre-folded into per-(n, c) scale/shift outside the hot loop.
    o_ref[...] = jnp.maximum(y_ref[...] * scale_ref[...] + shift_ref[...],
                             0.0).astype(o_ref.dtype)


# ------------------------------- wrapper -------------------------------------

def relu_ins_conv_transpose2d(x, w_t, b_conv, gamma, beta,
                              *, stride, padding, output_padding, eps=1e-5):
    """x: (N, C_in, H, W) f32.  w_t: (C_in, C_out, k, k) (PyTorch ConvTranspose2d
    weight layout).  b_conv: (C_out,).  gamma/beta: per-channel affine params
    (any shape reshapeable to (C_out,))."""
    N, C_in, H_in, W_in = x.shape
    _, C_out, k, _ = w_t.shape
    assert padding <= k - 1, "requires padding <= kernel_size - 1"
    H_out = (H_in - 1) * stride - 2 * padding + k + output_padding
    W_out = (W_in - 1) * stride - 2 * padding + k + output_padding
    Hp, Wp = H_out + k - 1, W_out + k - 1          # padded ("haloed") spatial extents
    lo = k - 1 - padding
    hi = lo + output_padding

    # ---- glue (input-sized work only): dilate + pad, channel-major flatten ----
    x_pad = lax.pad(x.astype(jnp.float32), jnp.array(0.0, jnp.float32),
                    ((0, 0, 0), (0, 0, 0),
                     (lo, hi, stride - 1), (lo, hi, stride - 1)))   # (N, C_in, Hp, Wp)
    x_flat = x_pad.transpose(1, 0, 2, 3).reshape(C_in, N * Hp * Wp)

    # per-tap spatially flipped weights: w_taps[i*k+j, co, ci] = w_t[ci, co, k-1-i, k-1-j]
    w_taps = jnp.flip(w_t, axis=(2, 3)).transpose(2, 3, 1, 0) \
                .reshape(k * k, C_out, C_in).astype(jnp.float32)
    b2 = b_conv.reshape(C_out, 1).astype(jnp.float32)

    # ---- Pallas fused conv-transpose kernel, lane-dense (C_out, spatial) output ----
    M = N * Hp * Wp
    max_shift = (k - 1) * Wp + (k - 1)
    TM = max(512, ((max_shift + 127) // 128) * 128)     # lane tile, multiple of 256
    n_tiles = pl.cdiv(M, TM)
    M_pad = n_tiles * TM
    x_flat = jnp.pad(x_flat, ((0, 0), (0, M_pad + TM - M)))    # + one halo tile of zeros

    y_flat = pl.pallas_call(
        functools.partial(_convt_fused_kernel, k=k, wp=Wp, tm=TM),
        out_shape=jax.ShapeDtypeStruct((C_out, M_pad), jnp.float32),
        grid=(n_tiles,),
        in_specs=[
            pl.BlockSpec((C_in, TM), lambda s: (0, s)),          # current tile
            pl.BlockSpec((C_in, TM), lambda s: (0, s + 1)),      # halo tile
            pl.BlockSpec((k * k, C_out, C_in), lambda s: (0, 0, 0)),
            pl.BlockSpec((C_out, 1), lambda s: (0, 0)),
        ],
        out_specs=pl.BlockSpec((C_out, TM), lambda s: (0, s)),
        compiler_params=pltpu.CompilerParams(dimension_semantics=("parallel",)),
    )(x_flat, x_flat, w_taps, b2)

    # Single XLA repack pass: drop the halo rows/cols and land in NCHW (lane-dense HW).
    # TODO(synk): for very large tensors this copy could be folded into the LN apply
    # kernel's out_specs (per-sample (C,Ho,Wo) blocks need no data transpose).
    HW = H_out * W_out
    y = y_flat[:, :M].reshape(C_out, N, Hp, Wp)[:, :, :H_out, :W_out]
    y = y.transpose(1, 0, 2, 3).reshape(N, C_out, HW)

    # ---- tiled two-pass LayerNorm over (C,H,W) + per-channel affine + ReLU ----
    THW = HW
    if HW % 128 == 0:                       # bound VMEM per tile (~2 MiB), keep lanes dense
        while THW % 256 == 0 and C_out * THW * 4 > (2 << 20):
            THW //= 2
    T = HW // THW

    s_out, ss_out = pl.pallas_call(
        _ln_stats_kernel,
        out_shape=(jax.ShapeDtypeStruct((N, 8, 128), jnp.float32),
                   jax.ShapeDtypeStruct((N, 8, 128), jnp.float32)),
        grid=(N, T),
        in_specs=[pl.BlockSpec((1, C_out, THW), lambda n, t: (n, 0, t))],
        out_specs=[pl.BlockSpec((1, 8, 128), lambda n, t: (n, 0, 0)),
                   pl.BlockSpec((1, 8, 128), lambda n, t: (n, 0, 0))],
        compiler_params=pltpu.CompilerParams(
            dimension_semantics=("parallel", "arbitrary")),
    )(y)

    cnt = jnp.float32(C_out * HW)
    mean = s_out[:, 0, 0] / cnt                          # (N,)
    var = ss_out[:, 0, 0] / cnt - mean * mean            # biased var, matches F.layer_norm
    rstd = lax.rsqrt(var + eps)
    g = gamma.reshape(C_out).astype(jnp.float32)
    b = beta.reshape(C_out).astype(jnp.float32)
    scale = g[None, :] * rstd[:, None]                   # (N, C)
    shift = b[None, :] - mean[:, None] * scale           # (N, C)
    scale = scale[:, :, None]                            # (N, C, 1)
    shift = shift[:, :, None]

    out = pl.pallas_call(
        _ln_apply_kernel,
        out_shape=jax.ShapeDtypeStruct((N, C_out, HW), jnp.float32),
        grid=(N, T),
        in_specs=[pl.BlockSpec((1, C_out, THW), lambda n, t: (n, 0, t)),
                  pl.BlockSpec((1, C_out, 1), lambda n, t: (n, 0, 0)),
                  pl.BlockSpec((1, C_out, 1), lambda n, t: (n, 0, 0))],
        out_specs=pl.BlockSpec((1, C_out, THW), lambda n, t: (n, 0, t)),
        compiler_params=pltpu.CompilerParams(
            dimension_semantics=("parallel", "parallel")),
    )(y, scale, shift)

    return out.reshape(N, C_out, H_out, W_out)


# ------------------------------- reference -----------------------------------

def reference(x, w_t, b_conv, gamma, beta, *, stride, padding, output_padding):
    C_in, C_out, k, _ = w_t.shape
    lo = k - 1 - padding
    hi = k - 1 - padding + output_padding
    w_conv = jnp.flip(w_t, axis=(2, 3)).transpose(1, 0, 2, 3)     # (C_out, C_in, k, k)
    y = lax.conv_general_dilated(
        x, w_conv, window_strides=(1, 1),
        padding=((lo, hi), (lo, hi)), lhs_dilation=(stride, stride),
        dimension_numbers=("NCHW", "OIHW", "NCHW"))
    y = y + b_conv[None, :, None, None]
    mean = y.mean(axis=(1, 2, 3), keepdims=True)
    var = ((y - mean) ** 2).mean(axis=(1, 2, 3), keepdims=True)
    yn = (y - mean) / jnp.sqrt(var + 1e-5)
    out = yn * gamma.reshape(1, C_out, 1, 1) + beta.reshape(1, C_out, 1, 1)
    return jnp.maximum(out, 0.0)


# --------------------------------- main ---------------------------------------

if __name__ == "__main__":
    # Module config (small, consistent with typical DRIT decoder usage)
    N, C_in, C_out = 2, 4, 4
    H = W = 8
    kernel_size, stride, padding, output_padding = 3, 2, 1, 1

    key = jax.random.PRNGKey(0)
    kx, kw, kb = jax.random.split(key, 3)

    x = jax.random.normal(kx, (N, C_in, H, W), dtype=jnp.float32)
    # gaussian_weights_init: ConvTranspose2d weight ~ N(0, 0.02); small bias
    w_t = 0.02 * jax.random.normal(kw, (C_in, C_out, kernel_size, kernel_size),
                                   dtype=jnp.float32)
    b_conv = 0.01 * jax.random.normal(kb, (C_out,), dtype=jnp.float32)
    # LayerNorm affine params: ones / zeros (PyTorch defaults)
    gamma = jnp.ones((C_out, 1), dtype=jnp.float32)
    beta = jnp.zeros((C_out, 1), dtype=jnp.float32)

    fn = functools.partial(relu_ins_conv_transpose2d,
                           stride=stride, padding=padding,
                           output_padding=output_padding)
    out = jax.jit(fn)(x, w_t, b_conv, gamma, beta)
    out = jax.block_until_ready(out)

    ref = reference(x, w_t, b_conv, gamma, beta,
                    stride=stride, padding=padding,
                    output_padding=output_padding)
    assert out.shape == (N, C_out, 16, 16), out.shape
    assert jnp.allclose(out, ref, atol=1e-4, rtol=1e-4), \
        float(jnp.max(jnp.abs(out - ref)))

    print("KERNEL_OK")
</pallas_src>

<mosaic_0001>
module attributes {stable_mosaic.version = 11 : i64} {
  func.func @_ln_stats_kernel(%arg0: i32, %arg1: i32, %arg2: memref<1x4x256xf32, #tpu.memory_space<vmem>>, %arg3: memref<1x8x128xf32, #tpu.memory_space<vmem>>, %arg4: memref<1x8x128xf32, #tpu.memory_space<vmem>>) attributes {dimension_semantics = [#tpu.dimension_semantics<parallel>, #tpu.dimension_semantics<arbitrary>], iteration_bounds = array<i64: 2, 1>, scalar_prefetch = 0 : i64, scratch_operands = 0 : i64, tpu.core_type = #tpu.core_type<tc>, window_params = [{transform_indices = @transform_0, window_bounds = array<i64: 1, 4, 256>}, {transform_indices = @transform_1, window_bounds = array<i64: 1, 8, 128>}, {transform_indices = @transform_2, window_bounds = array<i64: 1, 8, 128>}]} {
    %c0_i32 = arith.constant 0 : i32
    %0 = arith.cmpi eq, %arg1, %c0_i32 : i32
    %1 = arith.extui %0 : i1 to i32
    %c0_i32_0 = arith.constant 0 : i32
    %2 = arith.cmpi ne, %1, %c0_i32_0 : i32
    scf.if %2 {
      %cst_16 = arith.constant 0.000000e+00 : f32
      %21 = vector.broadcast %cst_16 : f32 to vector<1x8x128xf32>
      %c0_17 = arith.constant 0 : index
      %c0_18 = arith.constant 0 : index
      %c0_19 = arith.constant 0 : index
      %22 = vector.load %arg3[%c0_17, %c0_18, %c0_19] : memref<1x8x128xf32, #tpu.memory_space<vmem>>, vector<1x8x128xf32>
      tpu.vector_store %arg3[%c0_17, %c0_18, %c0_19], %21 {strides = array<i32>} : memref<1x8x128xf32, #tpu.memory_space<vmem>>, vector<1x8x128xf32>,
      %cst_20 = arith.constant 0.000000e+00 : f32
      %23 = vector.broadcast %cst_20 : f32 to vector<1x8x128xf32>
      %c0_21 = arith.constant 0 : index
      %c0_22 = arith.constant 0 : index
      %c0_23 = arith.constant 0 : index
      %24 = vector.load %arg4[%c0_21, %c0_22, %c0_23] : memref<1x8x128xf32, #tpu.memory_space<vmem>>, vector<1x8x128xf32>
      tpu.vector_store %arg4[%c0_21, %c0_22, %c0_23], %23 {strides = array<i32>} : memref<1x8x128xf32, #tpu.memory_space<vmem>>, vector<1x8x128xf32>,
    } else {
    }
    %c0 = arith.constant 0 : index
    %c0_1 = arith.constant 0 : index
    %c0_2 = arith.constant 0 : index
    %3 = vector.load %arg2[%c0, %c0_1, %c0_2] : memref<1x4x256xf32, #tpu.memory_space<vmem>>, vector<1x4x256xf32>
    %c0_3 = arith.constant 0 : index
    %c0_4 = arith.constant 0 : index
    %c0_5 = arith.constant 0 : index
    %4 = vector.load %arg3[%c0_3, %c0_4, %c0_5] : memref<1x8x128xf32, #tpu.memory_space<vmem>>, vector<1x8x128xf32>
    %5 = vector.shape_cast %3 : vector<1x4x256xf32> to vector<1x1x4x256xf32>
    %cst = arith.constant dense<0.000000e+00> : vector<1xf32>
    %6 = vector.multi_reduction <add>, %5, %cst [1, 2, 3] : vector<1x1x4x256xf32> to vector<1xf32>
    %7 = vector.shape_cast %6 : vector<1xf32> to vector<1x1x1x1xf32>
    %8 = vector.extract %7[0, 0, 0, 0] : f32 from vector<1x1x1x1xf32>
    %9 = vector.broadcast %8 : f32 to vector<1x8x128xf32>
    %10 = arith.addf %4, %9 : vector<1x8x128xf32>
    %c0_6 = arith.constant 0 : index
    %c0_7 = arith.constant 0 : index
    %c0_8 = arith.constant 0 : index
    %11 = vector.load %arg3[%c0_6, %c0_7, %c0_8] : memref<1x8x128xf32, #tpu.memory_space<vmem>>, vector<1x8x128xf32>
    tpu.vector_store %arg3[%c0_6, %c0_7, %c0_8], %10 {strides = array<i32>} : memref<1x8x128xf32, #tpu.memory_space<vmem>>, vector<1x8x128xf32>,
    %c0_9 = arith.constant 0 : index
    %c0_10 = arith.constant 0 : index
    %c0_11 = arith.constant 0 : index
    %12 = vector.load %arg4[%c0_9, %c0_10, %c0_11] : memref<1x8x128xf32, #tpu.memory_space<vmem>>, vector<1x8x128xf32>
    %13 = arith.mulf %3, %3 : vector<1x4x256xf32>
    %14 = vector.shape_cast %13 : vector<1x4x256xf32> to vector<1x1x4x256xf32>
    %cst_12 = arith.constant dense<0.000000e+00> : vector<1xf32>
    %15 = vector.multi_reduction <add>, %14, %cst_12 [1, 2, 3] : vector<1x1x4x256xf32> to vector<1xf32>
    %16 = vector.shape_cast %15 : vector<1xf32> to vector<1x1x1x1xf32>
    %17 = vector.extract %16[0, 0, 0, 0] : f32 from vector<1x1x1x1xf32>
    %18 = vector.broadcast %17 : f32 to vector<1x8x128xf32>
    %19 = arith.addf %12, %18 : vector<1x8x128xf32>
    %c0_13 = arith.constant 0 : index
    %c0_14 = arith.constant 0 : index
    %c0_15 = arith.constant 0 : index
    %20 = vector.load %arg4[%c0_13, %c0_14, %c0_15] : memref<1x8x128xf32, #tpu.memory_space<vmem>>, vector<1x8x128xf32>
    tpu.vector_store %arg4[%c0_13, %c0_14, %c0_15], %19 {strides = array<i32>} : memref<1x8x128xf32, #tpu.memory_space<vmem>>, vector<1x8x128xf32>,
    return
  }
  func.func @transform_0(%arg0: i32, %arg1: i32) -> (i32, i32, i32) {
    %c0_i32 = arith.constant 0 : i32
    %c0_i32_0 = arith.constant 0 : i32
    return %arg0, %c0_i32, %arg1 : i32, i32, i32
  }
  func.func @transform_1(%arg0: i32, %arg1: i32) -> (i32, i32, i32) {
    %c0_i32 = arith.constant 0 : i32
    %c0_i32_0 = arith.constant 0 : i32
    %c0_i32_1 = arith.constant 0 : i32
    return %arg0, %c0_i32, %c0_i32_0 : i32, i32, i32
  }
  func.func @transform_2(%arg0: i32, %arg1: i32) -> (i32, i32, i32) {
    %c0_i32 = arith.constant 0 : i32
    %c0_i32_0 = arith.constant 0 : i32
    %c0_i32_1 = arith.constant 0 : i32
    return %arg0, %c0_i32, %c0_i32_0 : i32, i32, i32
  }
}

module attributes {stable_mosaic.version = 11 : i64} {
  func.func @_convt_fused_kernel(%arg0: i32, %arg1: memref<4x512xf32, #tpu.memory_space<vmem>>, %arg2: memref<4x512xf32, #tpu.memory_space<vmem>>, %arg3: memref<9x4x4xf32, #tpu.memory_space<vmem>>, %arg4: memref<4x1xf32, #tpu.memory_space<vmem>>, %arg5: memref<4x512xf32, #tpu.memory_space<vmem>>) attributes {dimension_semantics = [#tpu.dimension_semantics<parallel>], iteration_bounds = array<i64: 2>, scalar_prefetch = 0 : i64, scratch_operands = 0 : i64, tpu.core_type = #tpu.core_type<tc>, window_params = [{transform_indices = @transform_0, window_bounds = array<i64: 4, 512>}, {transform_indices = @transform_1, window_bounds = array<i64: 4, 512>}, {pipeline_mode = #tpu.pipeline_mode<synchronous>, transform_indices = @transform_2, window_bounds = array<i64: 9, 4, 4>}, {pipeline_mode = #tpu.pipeline_mode<synchronous>, transform_indices = @transform_3, window_bounds = array<i64: 4, 1>}, {transform_indices = @transform_4, window_bounds = array<i64: 4, 512>}]} {
    %c0 = arith.constant 0 : index
    %c0_0 = arith.constant 0 : index
    %0 = vector.load %arg1[%c0, %c0_0] : memref<4x512xf32, #tpu.memory_space<vmem>>, vector<4x512xf32>
    %c0_1 = arith.constant 0 : index
    %c0_2 = arith.constant 0 : index
    %1 = vector.load %arg2[%c0_1, %c0_2] : memref<4x512xf32, #tpu.memory_space<vmem>>, vector<4x512xf32>
    %2 = tpu.concatenate %0, %1 in 1 : vector<4x512xf32>, vector<4x512xf32> -> vector<4x1024xf32>
    %cst = arith.constant 0.000000e+00 : f32
    %3 = vector.broadcast %cst : f32 to vector<4x512xf32>
    %4 = vector.extract_strided_slice %2 {offsets = [0, 0], sizes = [4, 512], strides = [1, 1]} : vector<4x1024xf32> to vector<4x512xf32>
    %c0_3 = arith.constant 0 : index
    %c0_4 = arith.constant 0 : index
    %c0_5 = arith.constant 0 : index
    %5 = vector.load %arg3[%c0_3, %c0_4, %c0_5] : memref<9x4x4xf32, #tpu.memory_space<vmem>>, vector<1x4x4xf32>
    %6 = vector.shape_cast %5 : vector<1x4x4xf32> to vector<4x4xf32>
    %cst_6 = arith.constant dense<0.000000e+00> : vector<4x512xf32>
    %7 = tpu.matmul %6, %4, %cst_6 {dimension_numbers = #tpu.dot_dimension_numbers<[1], [0], [0], [1], [0, 0, 1, 1], [], []>} : vector<4x4xf32>, vector<4x512xf32>, vector<4x512xf32> -> vector<4x512xf32>
    %8 = arith.addf %3, %7 : vector<4x512xf32>
    %9 = vector.extract_strided_slice %2 {offsets = [0, 1], sizes = [4, 512], strides = [1, 1]} : vector<4x1024xf32> to vector<4x512xf32>
    %c1 = arith.constant 1 : index
    %c0_7 = arith.constant 0 : index
    %c0_8 = arith.constant 0 : index
    %10 = vector.load %arg3[%c1, %c0_7, %c0_8] : memref<9x4x4xf32, #tpu.memory_space<vmem>>, vector<1x4x4xf32>
    %11 = vector.shape_cast %10 : vector<1x4x4xf32> to vector<4x4xf32>
    %cst_9 = arith.constant dense<0.000000e+00> : vector<4x512xf32>
    %12 = tpu.matmul %11, %9, %cst_9 {dimension_numbers = #tpu.dot_dimension_numbers<[1], [0], [0], [1], [0, 0, 1, 1], [], []>} : vector<4x4xf32>, vector<4x512xf32>, vector<4x512xf32> -> vector<4x512xf32>
    %13 = arith.addf %8, %12 : vector<4x512xf32>
    %14 = vector.extract_strided_slice %2 {offsets = [0, 2], sizes = [4, 512], strides = [1, 1]} : vector<4x1024xf32> to vector<4x512xf32>
    %c2 = arith.constant 2 : index
    %c0_10 = arith.constant 0 : index
    %c0_11 = arith.constant 0 : index
    %15 = vector.load %arg3[%c2, %c0_10, %c0_11] : memref<9x4x4xf32, #tpu.memory_space<vmem>>, vector<1x4x4xf32>
    %16 = vector.shape_cast %15 : vector<1x4x4xf32> to vector<4x4xf32>
    %cst_12 = arith.constant dense<0.000000e+00> : vector<4x512xf32>
    %17 = tpu.matmul %16, %14, %cst_12 {dimension_numbers = #tpu.dot_dimension_numbers<[1], [0], [0], [1], [0, 0, 1, 1], [], []>} : vector<4x4xf32>, vector<4x512xf32>, vector<4x512xf32> -> vector<4x512xf32>
    %18 = arith.addf %13, %17 : vector<4x512xf32>
    %19 = vector.extract_strided_slice %2 {offsets = [0, 18], sizes = [4, 512], strides = [1, 1]} : vector<4x1024xf32> to vector<4x512xf32>
    %c3 = arith.constant 3 : index
    %c0_13 = arith.constant 0 : index
    %c0_14 = arith.constant 0 : index
    %20 = vector.load %arg3[%c3, %c0_13, %c0_14] : memref<9x4x4xf32, #tpu.memory_space<vmem>>, vector<1x4x4xf32>
    %21 = vector.shape_cast %20 : vector<1x4x4xf32> to vector<4x4xf32>
    %cst_15 = arith.constant dense<0.000000e+00> : vector<4x512xf32>
    %22 = tpu.matmul %21, %19, %cst_15 {dimension_numbers = #tpu.dot_dimension_numbers<[1], [0], [0], [1], [0, 0, 1, 1], [], []>} : vector<4x4xf32>, vector<4x512xf32>, vector<4x512xf32> -> vector<4x512xf32>
    %23 = arith.addf %18, %22 : vector<4x512xf32>
    %24 = vector.extract_strided_slice %2 {offsets = [0, 19], sizes = [4, 512], strides = [1, 1]} : vector<4x1024xf32> to vector<4x512xf32>
    %c4 = arith.constant 4 : index
    %c0_16 = arith.constant 0 : index
    %c0_17 = arith.constant 0 : index
    %25 = vector.load %arg3[%c4, %c0_16, %c0_17] : memref<9x4x4xf32, #tpu.memory_space<vmem>>, vector<1x4x4xf32>
    %26 = vector.shape_cast %25 : vector<1x4x4xf32> to vector<4x4xf32>
    %cst_18 = arith.constant dense<0.000000e+00> : vector<4x512xf32>
    %27 = tpu.matmul %26, %24, %cst_18 {dimension_numbers = #tpu.dot_dimension_numbers<[1], [0], [0], [1], [0, 0, 1, 1], [], []>} : vector<4x4xf32>, vector<4x512xf32>, vector<4x512xf32> -> vector<4x512xf32>
    %28 = arith.addf %23, %27 : vector<4x512xf32>
    %29 = vector.extract_strided_slice %2 {offsets = [0, 20], sizes = [4, 512], strides = [1, 1]} : vector<4x1024xf32> to vector<4x512xf32>
    %c5 = arith.constant 5 : index
    %c0_19 = arith.constant 0 : index
    %c0_20 = arith.constant 0 : index
    %30 = vector.load %arg3[%c5, %c0_19, %c0_20] : memref<9x4x4xf32, #tpu.memory_space<vmem>>, vector<1x4x4xf32>
    %31 = vector.shape_cast %30 : vector<1x4x4xf32> to vector<4x4xf32>
    %cst_21 = arith.constant dense<0.000000e+00> : vector<4x512xf32>
    %32 = tpu.matmul %31, %29, %cst_21 {dimension_numbers = #tpu.dot_dimension_numbers<[1], [0], [0], [1], [0, 0, 1, 1], [], []>} : vector<4x4xf32>, vector<4x512xf32>, vector<4x512xf32> -> vector<4x512xf32>
    %33 = arith.addf %28, %32 : vector<4x512xf32>
    %34 = vector.extract_strided_slice %2 {offsets = [0, 36], sizes = [4, 512], strides = [1, 1]} : vector<4x1024xf32> to vector<4x512xf32>
    %c6 = arith.constant 6 : index
    %c0_22 = arith.constant 0 : index
    %c0_23 = arith.constant 0 : index
    %35 = vector.load %arg3[%c6, %c0_22, %c0_23] : memref<9x4x4xf32, #tpu.memory_space<vmem>>, vector<1x4x4xf32>
    %36 = vector.shape_cast %35 : vector<1x4x4xf32> to vector<4x4xf32>
    %cst_24 = arith.constant dense<0.000000e+00> : vector<4x512xf32>
    %37 = tpu.matmul %36, %34, %cst_24 {dimension_numbers = #tpu.dot_dimension_numbers<[1], [0], [0], [1], [0, 0, 1, 1], [], []>} : vector<4x4xf32>, vector<4x512xf32>, vector<4x512xf32> -> vector<4x512xf32>
    %38 = arith.addf %33, %37 : vector<4x512xf32>
    %39 = vector.extract_strided_slice %2 {offsets = [0, 37], sizes = [4, 512], strides = [1, 1]} : vector<4x1024xf32> to vector<4x512xf32>
    %c7 = arith.constant 7 : index
    %c0_25 = arith.constant 0 : index
    %c0_26 = arith.constant 0 : index
    %40 = vector.load %arg3[%c7, %c0_25, %c0_26] : memref<9x4x4xf32, #tpu.memory_space<vmem>>, vector<1x4x4xf32>
    %41 = vector.shape_cast %40 : vector<1x4x4xf32> to vector<4x4xf32>
    %cst_27 = arith.constant dense<0.000000e+00> : vector<4x512xf32>
    %42 = tpu.matmul %41, %39, %cst_27 {dimension_numbers = #tpu.dot_dimension_numbers<[1], [0], [0], [1], [0, 0, 1, 1], [], []>} : vector<4x4xf32>, vector<4x512xf32>, vector<4x512xf32> -> vector<4x512xf32>
    %43 = arith.addf %38, %42 : vector<4x512xf32>
    %44 = vector.extract_strided_slice %2 {offsets = [0, 38], sizes = [4, 512], strides = [1, 1]} : vector<4x1024xf32> to vector<4x512xf32>
    %c8 = arith.constant 8 : index
    %c0_28 = arith.constant 0 : index
    %c0_29 = arith.constant 0 : index
    %45 = vector.load %arg3[%c8, %c0_28, %c0_29] : memref<9x4x4xf32, #tpu.memory_space<vmem>>, vector<1x4x4xf32>
    %46 = vector.shape_cast %45 : vector<1x4x4xf32> to vector<4x4xf32>
    %cst_30 = arith.constant dense<0.000000e+00> : vector<4x512xf32>
    %47 = tpu.matmul %46, %44, %cst_30 {dimension_numbers = #tpu.dot_dimension_numbers<[1], [0], [0], [1], [0, 0, 1, 1], [], []>} : vector<4x4xf32>, vector<4x512xf32>, vector<4x512xf32> -> vector<4x512xf32>
    %48 = arith.addf %43, %47 : vector<4x512xf32>
    %c0_31 = arith.constant 0 : index
    %c0_32 = arith.constant 0 : index
    %49 = vector.load %arg4[%c0_31, %c0_32] : memref<4x1xf32, #tpu.memory_space<vmem>>, vector<4x1xf32>
    %50 = vector.broadcast %49 : vector<4x1xf32> to vector<4x512xf32>
    %51 = arith.addf %48, %50 : vector<4x512xf32>
    %c0_33 = arith.constant 0 : index
    %c0_34 = arith.constant 0 : index
    %52 = vector.load %arg5[%c0_33, %c0_34] : memref<4x512xf32, #tpu.memory_space<vmem>>, vector<4x512xf32>
    tpu.vector_store %arg5[%c0_33, %c0_34], %51 {strides = array<i32>} : memref<4x512xf32, #tpu.memory_space<vmem>>, vector<4x512xf32>,
    return
  }
  func.func @transform_0(%arg0: i32) -> (i32, i32) {
    %c0_i32 = arith.constant 0 : i32
    %c0_i32_0 = arith.constant 0 : i32
    return %c0_i32, %arg0 : i32, i32
  }
  func.func @transform_1(%arg0: i32) -> (i32, i32) {
    %c1_i32 = arith.constant 1 : i32
    %0 = arith.addi %arg0, %c1_i32 : i32
    %c0_i32 = arith.constant 0 : i32
    %c0_i32_0 = arith.constant 0 : i32
    return %c0_i32, %0 : i32, i32
  }
  func.func @transform_2(%arg0: i32) -> (i32, i32, i32) {
    %c0_i32 = arith.constant 0 : i32
    %c0_i32_0 = arith.constant 0 : i32
    %c0_i32_1 = arith.constant 0 : i32
    %c0_i32_2 = arith.constant 0 : i32
    return %c0_i32, %c0_i32_0, %c0_i32_1 : i32, i32, i32
  }
  func.func @transform_3(%arg0: i32) -> (i32, i32) {
    %c0_i32 = arith.constant 0 : i32
    %c0_i32_0 = arith.constant 0 : i32
    %c0_i32_1 = arith.constant 0 : i32
    return %c0_i32, %c0_i32_0 : i32, i32
  }
  func.func @transform_4(%arg0: i32) -> (i32, i32) {
    %c0_i32 = arith.constant 0 : i32
    %c0_i32_0 = arith.constant 0 : i32
    return %c0_i32, %arg0 : i32, i32
  }
}

module attributes {stable_mosaic.version = 11 : i64} {
  func.func @_ln_apply_kernel(%arg0: i32, %arg1: i32, %arg2: memref<1x4x256xf32, #tpu.memory_space<vmem>>, %arg3: memref<1x4x1xf32, #tpu.memory_space<vmem>>, %arg4: memref<1x4x1xf32, #tpu.memory_space<vmem>>, %arg5: memref<1x4x256xf32, #tpu.memory_space<vmem>>) attributes {dimension_semantics = [#tpu.dimension_semantics<parallel>, #tpu.dimension_semantics<parallel>], iteration_bounds = array<i64: 2, 1>, scalar_prefetch = 0 : i64, scratch_operands = 0 : i64, tpu.core_type = #tpu.core_type<tc>, window_params = [{transform_indices = @transform_0, window_bounds = array<i64: 1, 4, 256>}, {transform_indices = @transform_1, window_bounds = array<i64: 1, 4, 1>}, {transform_indices = @transform_2, window_bounds = array<i64: 1, 4, 1>}, {transform_indices = @transform_3, window_bounds = array<i64: 1, 4, 256>}]} {
    %c0 = arith.constant 0 : index
    %c0_0 = arith.constant 0 : index
    %c0_1 = arith.constant 0 : index
    %0 = vector.load %arg2[%c0, %c0_0, %c0_1] : memref<1x4x256xf32, #tpu.memory_space<vmem>>, vector<1x4x256xf32>
    %c0_2 = arith.constant 0 : index
    %c0_3 = arith.constant 0 : index
    %c0_4 = arith.constant 0 : index
    %1 = vector.load %arg3[%c0_2, %c0_3, %c0_4] : memref<1x4x1xf32, #tpu.memory_space<vmem>>, vector<1x4x1xf32>
    %2 = vector.broadcast %1 : vector<1x4x1xf32> to vector<1x4x256xf32>
    %3 = arith.mulf %0, %2 : vector<1x4x256xf32>
    %c0_5 = arith.constant 0 : index
    %c0_6 = arith.constant 0 : index
    %c0_7 = arith.constant 0 : index
    %4 = vector.load %arg4[%c0_5, %c0_6, %c0_7] : memref<1x4x1xf32, #tpu.memory_space<vmem>>, vector<1x4x1xf32>
    %5 = vector.broadcast %4 : vector<1x4x1xf32> to vector<1x4x256xf32>
    %6 = arith.addf %3, %5 : vector<1x4x256xf32>
    %cst = arith.constant 0.000000e+00 : f32
    %7 = vector.broadcast %cst : f32 to vector<1x4x256xf32>
    %8 = arith.maximumf %6, %7 : vector<1x4x256xf32>
    %c0_8 = arith.constant 0 : index
    %c0_9 = arith.constant 0 : index
    %c0_10 = arith.constant 0 : index
    %9 = vector.load %arg5[%c0_8, %c0_9, %c0_10] : memref<1x4x256xf32, #tpu.memory_space<vmem>>, vector<1x4x256xf32>
    tpu.vector_store %arg5[%c0_8, %c0_9, %c0_10], %8 {strides = array<i32>} : memref<1x4x256xf32, #tpu.memory_space<vmem>>, vector<1x4x256xf32>,
    return
  }
  func.func @transform_0(%arg0: i32, %arg1: i32) -> (i32, i32, i32) {
    %c0_i32 = arith.constant 0 : i32
    %c0_i32_0 = arith.constant 0 : i32
    return %arg0, %c0_i32, %arg1 : i32, i32, i32
  }
  func.func @transform_1(%arg0: i32, %arg1: i32) -> (i32, i32, i32) {
    %c0_i32 = arith.constant 0 : i32
    %c0_i32_0 = arith.constant 0 : i32
    %c0_i32_1 = arith.constant 0 : i32
    return %arg0, %c0_i32, %c0_i32_0 : i32, i32, i32
  }
  func.func @transform_2(%arg0: i32, %arg1: i32) -> (i32, i32, i32) {
    %c0_i32 = arith.constant 0 : i32
    %c0_i32_0 = arith.constant 0 : i32
    %c0_i32_1 = arith.constant 0 : i32
    return %arg0, %c0_i32, %c0_i32_0 : i32, i32, i32
  }
  func.func @transform_3(%arg0: i32, %arg1: i32) -> (i32, i32, i32) {
    %c0_i32 = arith.constant 0 : i32
    %c0_i32_0 = arith.constant 0 : i32
    return %arg0, %c0_i32, %arg1 : i32, i32, i32
  }
}

</mosaic_0001>

<bundles_post_ra>
// kernel: relu_ins_conv_transpose2d.4
= control target key start
LH: loop header
LB: loop body
LE: loop exit
PB: predicated region body
PF: predicated region fallthrough
CT: control target
= control target key end

     0   :  { %s407_s9 = smov 0   ;;  %s409_s10 = smov 0   ;;  %s448_s0 = inlined_call_operand.vmem [shape: f32[2,4,256], index: 0, kind: input, shape index: {}]   ;;  %s449_s1 = inlined_call_operand.vmem [shape: f32[2,8,128], index: 1, kind: output, shape index: {0}]   ;;  %s450_s2 = inlined_call_operand.vmem [shape: f32[2,8,128], index: 2, kind: output, shape index: {1}]  }
   0x1   :  { %s411_s11 = smov 0  }
   0x2 LB: > { %s25_s12 = sadd.s32 1, %s386_s10  ;;  %p330_p0 = scmp.ge.s32.totalorder %s390_s11, 1  ;;  %s390_s11 = sphi %s411_s11, %s13_s11   ;;  %s386_s10 = sphi %s409_s10, %s452_s10   ;;  %s382_s9 = sphi %s407_s9, %s451_s9  }
   0x3   : > { %p27_p1 = scmp.ge.s32.totalorder %s25_s12, 2  ;;  %p134_p2 = scmp.lt.s32.totalorder %s390_s11, 3 }
   0x5   : > { %s454_s12 = smov (%p27_p1, %s25_s12), 0  ;;  %p135_p3 = pnand %p330_p0, %p134_p2 }
   0x6   : > { %p164_p4 = scmp.lt.s32.totalorder (!%p135_p3), %s382_s9, 1 }
   0x7   : > { %138 = sbr.rel (%p135_p3) target bundleno = 227 (0xe3), region = 24 }
   0xc   : > { %s456_s9 = smov (!%p164_p4, %s382_s9), 1  ;;  %vm192_vm0 = vcmask 1043456  }
   0xd   : > { %s425_s13 = sshll.u32 %s456_s9, 3 }
   0xe   : > { %s171_s16 = scalar_lea.vmem %s448_s0, %s425_s13  ;;  %s176_s20 = scalar_lea.vmem %s449_s1, %s425_s13 }
   0xf   : > { %v187_v0 = vld [vmem:[%s171_s16] sm:$0xff]  ;;  %s180_s24 = scalar_lea.vmem %s450_s2, %s425_s13 }
  0x10   : > { %v190_v1 = vcombine.high %v187_v0, %v187_v0  ;;  %v193_v2 = vsel %vm192_vm0, %v187_v0, 0.0  ;;  %v209_v3 = vmul.f32 %v187_v0, %v187_v0 }
  0x12   : > { %v194_v4 = vsel %vm192_vm0, %v190_v1, 0.0  ;;  %v211_v5 = vcombine.high %v209_v3, %v209_v3  ;;  %v213_v6 = vsel %vm192_vm0, %v209_v3, 0.0 }
  0x13   : > { %v195_v7 = vadd.f32 %v194_v4, %v193_v2 }
  0x14   : > { %v214_v8 = vsel %vm192_vm0, %v211_v5, 0.0 }
  0x15   : > { %196 = vadd.xlane.f32.xlu0 %v195_v7  ;;  %v215_v9 = vadd.f32 %v214_v8, %v213_v6 }
  0x19   : > { %216 = vadd.xlane.f32.xlu0 %v215_v9 }
  0x9e   : > { %v197_v10 = vpop.xlane.xlu0 %196 }
  0x9f   : > { %v198_v11 = vrot.slane %v197_v10, 4 }
  0xa1   : > { %v199_v12 = vadd.f32 %v198_v11, %v197_v10 }
  0xa2   : > { %v217_v13 = vpop.xlane.xlu0 %216 }
  0xa3   : > { %v200_v14 = vrot.slane %v199_v12, 2  ;;  %v218_v15 = vrot.slane %v217_v13, 4 }
  0xa5   : > { %v219_v16 = vadd.f32 %v218_v15, %v217_v13  ;;  %v201_v17 = vadd.f32 %v200_v14, %v199_v12 }
  0xa7   : > { %v220_v18 = vrot.slane %v219_v16, 2  ;;  %v202_v19 = vrot.slane %v201_v17, 1 }
  0xa9   : > { %v221_v20 = vadd.f32 %v220_v18, %v219_v16  ;;  %v203_v21 = vadd.f32 %v202_v19, %v201_v17 }
  0xab   : > { %338 = vpush %v203_v21  ;;  %v222_v22 = vrot.slane %v221_v20, 1 }
  0xad   : > { %v223_v23 = vadd.f32 %v222_v22, %v221_v20 }
  0xaf   : > { %340 = vpush %v223_v23 }
  0xdc   : > { %s339_s17 = spop %338 }
  0xdd   : > { %v205_v24 = vstv %s339_s17 }
  0xde   : > { %207 = vst [vmem:[%s176_s20] sm:$0xff] %v205_v24 }
  0xe0   : > { %s341_s21 = spop %340 }
  0xe1   : > { %v225_v25 = vstv %s341_s21 }
  0xe2   : > { %227 = vst [vmem:[%s180_s24] sm:$0xff] %v225_v25 }
  0xe3 PF: > { %s13_s11 = sadd.s32 1, %s390_s11   ;;  %s451_s9 = smov %s386_s10 }
  0xe4   : > { %p10_p5 = scmp.ge.s32.totalorder %s13_s11, 4   ;;  %s452_s10 = smov %s454_s12 }
  0xe6   :  { %12 = sbr.rel (!%p10_p5) target bundleno = 2 (0x2), region = 70 }

// kernel: relu_ins_conv_transpose2d.5
= control target key start
LH: loop header
LB: loop body
LE: loop exit
PB: predicated region body
PF: predicated region fallthrough
CT: control target
= control target key end

     0   :  { %s474_s12 = smov 0   ;;  %s476_s13 = smov 0   ;;  %s513_s0 = inlined_call_operand.vmem [shape: f32[2,4,256], index: 0, kind: input, shape index: {}]   ;;  %s514_s1 = inlined_call_operand.vmem [shape: f32[2,4,1], index: 1, kind: input, shape index: {}]   ;;  %s515_s2 = inlined_call_operand.vmem [shape: f32[2,4,1], index: 2, kind: input, shape index: {}]   ;;  %s516_s3 = inlined_call_operand.vmem [shape: f32[2,4,256], index: 3, kind: output, shape index: {}]  }
   0x1   :  { %s478_s14 = smov 0  }
   0x2 LB: > { %s25_s15 = sadd.s32 1, %s446_s13  ;;  %p390_p0 = scmp.ge.s32.totalorder %s450_s14, 1  ;;  %s450_s14 = sphi %s478_s14, %s13_s14   ;;  %s446_s13 = sphi %s476_s13, %s518_s13   ;;  %s442_s12 = sphi %s474_s12, %s517_s12  }
   0x3   : > { %p27_p1 = scmp.ge.s32.totalorder %s25_s15, 2  ;;  %p176_p2 = scmp.lt.s32.totalorder %s450_s14, 3 }
   0x5   : > { %s520_s15 = smov (%p27_p1, %s25_s15), 0  ;;  %p177_p3 = pnand %p390_p0, %p176_p2 }
   0x6   : > { %p217_p4 = scmp.lt.s32.totalorder (!%p177_p3), %s442_s12, 1 }
   0x7   : > { %180 = sbr.rel (%p177_p3) target bundleno = 151 (0x97), region = 32 }
   0xc   : > { %v452_v0 = vmov 0   ;;  %s522_s12 = smov (!%p217_p4, %s442_s12), 1  ;;  %v453_v3 = vmov 839922192   ;;  %v253_v5 = vlaneseq }
   0xd   : > { %427 = vset.pattern.permute.xlu0 %v452_v0  ;;  %s393_s16 = sshll.u32 %s522_s12, 2  ;;  %v251_v4 = vunpack.c.l.s4 %v453_v3  ;;  %s399_s23 = sshll.u32 %s522_s12, 3 }
   0xe   : > { %s229_s19 = scalar_lea.vmem %s514_s1, %s393_s16  ;;  %s233_s22 = scalar_lea.vmem %s515_s2, %s393_s16  ;;  %v254_v7 = vshrl.u32 %v253_v5, 7 }
   0xf   : > { %v245_v1 = vld [vmem:[%s229_s19] sm:$0xf]  ;;  %v252_v6 = vunpack.c.0.s8 %v251_v4  ;;  %s224_s26 = scalar_lea.vmem %s513_s0, %s399_s23  ;;  %s242_s29 = scalar_lea.vmem %s516_s3, %s399_s23 }
  0x10   : > { %248 = vperm.xlu0 %427, %v245_v1   ;;  %v259_v2 = vld [vmem:[%s233_s22] sm:$0xf] }
  0x11   : > { %v255_v8 = vsub.s32 %v252_v6, %v254_v7  ;;  %v244_v11 = vld [vmem:[%s224_s26] sm:$0xff] }
  0x14   : > { %262 = vperm.xlu0 %427, %v259_v2  }
  0x8b   : > { %v249_v9 = vpop.permute.xlu0 %248 }
  0x8c   : > { %v256_v10 = vrot.slane %v249_v9, %v255_v8 }
  0x8e   : > { %v258_v13 = vmul.f32 %v256_v10, %v244_v11 }
  0x8f   : > { %v263_v12 = vpop.permute.xlu0 %262 }
  0x90   : > { %v270_v14 = vrot.slane %v263_v12, %v255_v8 }
  0x92   : > { %v272_v15 = vadd.f32 %v270_v14, %v258_v13 }
  0x94   : > { %v273_v16 = vmax.f32 %v272_v15, 0.0 }
  0x96   : > { %274 = vst [vmem:[%s242_s29] sm:$0xff] %v273_v16 }
  0x97 PF: > { %s13_s14 = sadd.s32 1, %s450_s14   ;;  %s517_s12 = smov %s446_s13 }
  0x98   : > { %p10_p5 = scmp.ge.s32.totalorder %s13_s14, 4   ;;  %s518_s13 = smov %s520_s15 }
  0x9a   :  { %12 = sbr.rel (!%p10_p5) target bundleno = 2 (0x2), region = 68 }

// kernel: relu_ins_conv_transpose2d.3
= control target key start
LH: loop header
LB: loop body
LE: loop exit
PB: predicated region body
PF: predicated region fallthrough
CT: control target
= control target key end

     0   :  { %s2011_s15 = smov 0   ;;  %s2204_s0 = inlined_call_operand.vmem [shape: f32[4,1536], index: 0, kind: input, shape index: {}, may-alias: {0,1}]   ;;  %s2205_s1 = inlined_call_operand.vmem [shape: f32[4,1536], index: 1, kind: input, shape index: {}, may-alias: {0,1}]   ;;  %s2206_s2 = inlined_call_operand.vmem [shape: f32[9,4,4], index: 2, kind: input, shape index: {}]   ;;  %s2207_s3 = inlined_call_operand.vmem [shape: f32[4,1], index: 3, kind: input, shape index: {}]   ;;  %s2208_s4 = inlined_call_operand.vmem [shape: f32[4,1024], index: 4, kind: output, shape index: {}]  }
   0x1 LB: > { %s1870_s16 = sadd.s32 4294967295, %s1974_s15   ;;  %p1874_p0 = scmp.ge.s32.totalorder %s1974_s15, 1  ;;  %s1974_s15 = sphi %s2011_s15, %s14_s15  }
   0x2   : > { %p178_p1 = scmp.lt.s32.totalorder %s1974_s15, 3 }
   0x4   : > { %p179_p2 = pnand %p1874_p0, %p178_p1 }
   0x5   : > { %s2019_s17 = sshll.u32 (!%p179_p2), %s1870_s16, 2  ;;  %s1977_s28 = smov (!%p179_p2), 127  }
   0x6   : > { %182 = sbr.rel (%p179_p2) target bundleno = 412 (0x19c), region = 36  ;;  %p211_p3 = scmp.lt.s32.totalorder (!%p179_p2), %s2019_s17, 11 }
   0x7   : > { %s1946_s18 = sadd.s32 (!%p179_p2), 4, %s2019_s17  ;;  %s1978_s29 = smov (!%p179_p2), 126  }
   0x8   : > { %p218_p4 = scmp.lt.s32.totalorder (!%p179_p2), %s1946_s18, 11  ;;  %s1979_s30 = smov (!%p179_p2), 110  }
   0x9   : > { %s1980_s5 = smov (!%p179_p2), 109   ;;  %s1981_s6 = smov (!%p179_p2), 108  }
   0xa   : > { %s1982_s7 = smov (!%p179_p2), 92   ;;  %s1983_s8 = smov (!%p179_p2), 91  }
   0xb   : > { %s212_s19 = scalar_select %p211_p3, %s2019_s17, 11  ;;  %v1976_v0 = vmov 0.0   ;;  %v1984_v6 = vmov 0   ;;  %v1782_v7 = vld [vmem:[%s2207_s3] sm:$0xf]  ;;  %vm251_vm0 = vcmask 1039360  }
   0xc   : > { %s2210_s18 = smov (!%p218_p4, %s1946_s18), 11  ;;  %333 = vmatprep.mubr.f32.mxu0 %v1976_v0  ;;  %404 = vmatprep.mubr.f32.mxu1 %v1976_v0  ;;  %s1985_s9 = smov 90   ;;  %vm260_vm1 = vcmask 1043456   ;;  %v1881_v14 = vld [vmem:[%s2206_s2 + $0x4] sm:$0xf]  ;;  %vm256_vm2 = vcmask 31744  }
   0xd   : > { %s1876_s20 = sshll.u32 %s212_s19, 2  ;;  %s1878_s24 = sshll.u32 %s2210_s18, 2  ;;  %1965 = vset.pattern.permute.xlu0 %v1984_v6  ;;  %vm576_vm3 = vcmask 1031168   ;;  %v238_v22 = vld [vmem:[%s2206_s2] sm:$0xf]  ;;  %vm750_vm4 = vcmask 900096  }
   0xe   : > { %s214_s23 = scalar_lea.vmem %s2204_s0, %s1876_s20  ;;  %s221_s27 = scalar_lea.vmem %s2205_s1, %s1878_s24  ;;  %v1894_v28 = vld [vmem:[%s2206_s2 + $0x8] sm:$0xf]  ;;  %v1901_v34 = vld [vmem:[%s2206_s2 + $0xc] sm:$0xf]  ;;  %vm924_vm5 = vcmask 891904   ;;  %vm1098_vm6 = vcmask 883712  }
   0xf   : > { %v2029_v1 = vld [vmem:[%s214_s23 + $0x8] sm:$0xff]  ;;  %v2031_v2 = vld [vmem:[%s214_s23] sm:$0xff]  ;;  %v1908_v44 = vld [vmem:[%s2206_s2 + $0x10] sm:$0xf]  ;;  %vm1272_vm7 = vcmask 752640   ;;  %vm1446_vm8 = vcmask 744448  }
  0x10   : > { %245 = vrot.lane.b32.xlu0 %v2029_v1, %s1977_s28  ;;  %241 = vrot.lane.b32.xlu1 %v2031_v2, %s1977_s28  ;;  %v2040_v3 = vcombine.high %v2029_v1, %v2029_v1  ;;  %v232_v4 = vld [vmem:[%s221_s27] sm:$0xff]  ;;  %v2045_v5 = vcombine.high %v2031_v2, %v2031_v2  ;;  %v1915_v54 = vld [vmem:[%s2206_s2 + $0x14] sm:$0xf]  ;;  %vm1620_vm9 = vcmask 736256   ;;  %p225_p5 = scmp.lt.s32.totalorder %s2019_s17, 7 }
  0x12   : > { %s2212_s17 = smov (!%p225_p5, %s2019_s17), 7 }
  0x14   : > { %249 = vrot.lane.b32.xlu0 %v232_v4, %s1977_s28  ;;  %247 = vrot.lane.b32.xlu1 %v2040_v3, %s1977_s28 }
  0x18   : > { %568 = vrot.lane.b32.xlu1 %v2045_v5, %s1978_s29  ;;  %243 = vrot.lane.b32.xlu0 %v2045_v5, %s1977_s28 }
  0x1c   : > { %566 = vrot.lane.b32.xlu1 %v2031_v2, %s1978_s29  ;;  %570 = vrot.lane.b32.xlu0 %v2029_v1, %s1978_s29 }
  0x20   : > { %574 = vrot.lane.b32.xlu1 %v232_v4, %s1978_s29  ;;  %572 = vrot.lane.b32.xlu0 %v2040_v3, %s1978_s29 }
  0x24   : > { %744 = vrot.lane.b32.xlu1 %v2029_v1, %s1979_s30  ;;  %742 = vrot.lane.b32.xlu0 %v2045_v5, %s1979_s30 }
  0x28   : > { %746 = vrot.lane.b32.xlu1 %v2040_v3, %s1979_s30  ;;  %740 = vrot.lane.b32.xlu0 %v2031_v2, %s1979_s30 }
  0x2c   : > { %916 = vrot.lane.b32.xlu1 %v2045_v5, %s1980_s5  ;;  %748 = vrot.lane.b32.xlu0 %v232_v4, %s1979_s30 }
  0x30   : > { %914 = vrot.lane.b32.xlu1 %v2031_v2, %s1980_s5  ;;  %918 = vrot.lane.b32.xlu0 %v2029_v1, %s1980_s5 }
  0x34   : > { %922 = vrot.lane.b32.xlu1 %v232_v4, %s1980_s5  ;;  %920 = vrot.lane.b32.xlu0 %v2040_v3, %s1980_s5 }
  0x38   : > { %1092 = vrot.lane.b32.xlu1 %v2029_v1, %s1981_s6  ;;  %1090 = vrot.lane.b32.xlu0 %v2045_v5, %s1981_s6 }
  0x3c   : > { %1094 = vrot.lane.b32.xlu1 %v2040_v3, %s1981_s6  ;;  %1088 = vrot.lane.b32.xlu0 %v2031_v2, %s1981_s6 }
  0x40   : > { %1264 = vrot.lane.b32.xlu1 %v2045_v5, %s1982_s7  ;;  %1096 = vrot.lane.b32.xlu0 %v232_v4, %s1981_s6  ;;  %s1880_s6 = sshll.u32 %s2212_s17, 2 }
  0x44   : > { %1262 = vrot.lane.b32.xlu1 %v2031_v2, %s1982_s7  ;;  %1266 = vrot.lane.b32.xlu0 %v2029_v1, %s1982_s7 }
  0x48   : > { %1270 = vrot.lane.b32.xlu1 %v232_v4, %s1982_s7  ;;  %1268 = vrot.lane.b32.xlu0 %v2040_v3, %s1982_s7 }
  0x4c   : > { %1440 = vrot.lane.b32.xlu1 %v2029_v1, %s1983_s8  ;;  %1438 = vrot.lane.b32.xlu0 %v2045_v5, %s1983_s8 }
  0x50   : > { %1442 = vrot.lane.b32.xlu1 %v2040_v3, %s1983_s8  ;;  %1436 = vrot.lane.b32.xlu0 %v2031_v2, %s1983_s8 }
  0x54   : > { %1612 = vrot.lane.b32.xlu1 %v2045_v5, %s1985_s9  ;;  %1444 = vrot.lane.b32.xlu0 %v232_v4, %s1983_s8 }
  0x58   : > { %1610 = vrot.lane.b32.xlu1 %v2031_v2, %s1985_s9  ;;  %1614 = vrot.lane.b32.xlu0 %v2029_v1, %s1985_s9 }
  0x5c   : > { %1618 = vrot.lane.b32.xlu1 %v232_v4, %s1985_s9  ;;  %1616 = vrot.lane.b32.xlu0 %v2040_v3, %s1985_s9  ;;  %s228_s9 = scalar_lea.vmem %s2208_s4, %s1880_s6 }
  0x60   : > { %1785 = vperm.xlu0 %1965, %v1782_v7  }
  0x82   : > { %v246_v8 = vpop.permute.xlu0 %245  ;;  %v242_v9 = vpop.permute.xlu1 %241 }
  0x86   : > { %v250_v10 = vpop.permute.xlu0 %249  ;;  %v248_v11 = vpop.permute.xlu1 %247 }
  0x87   : > { %v255_v12 = vsel %vm251_vm0, %v248_v11, %v250_v10  ;;  %v254_v13 = vsel %vm251_vm0, %v246_v8, %v248_v11  ;;  %v1929_v11 = vld [vmem:[%s2206_s2 + $0x1c] sm:$0xf] }
  0x88   : > { %1885 = vmatprep.subr.msk.mxu1 %vm260_vm1, %v255_v12 }
  0x89   : > { %1886 = vmatpush1.msk.msra.mxu1 %vm260_vm1, %v254_v13 }
  0x8a   : > { %v569_v15 = vpop.permute.xlu1 %568  ;;  %v244_v16 = vpop.permute.xlu0 %243  ;;  %1887 = vmatmul.mubr.msk.f32.vlgmr.msra.gmra.mxu1 %vm256_vm2, %v1881_v14  ;;  %1891 = vmatprep.subr.msk.mxu1 %vm260_vm1, %v2040_v3 }
  0x8b   : > { %v253_v17 = vsel %vm251_vm0, %v244_v16, %v246_v8  ;;  %v252_v18 = vsel %vm251_vm0, %v242_v9, %v244_v16  ;;  %1892 = vmatpush1.msk.msra.mxu1 %vm260_vm1, %v2029_v1  ;;  %557 = vmatprep.mubr.f32.mxu1 %v1976_v0  ;;  %v1922_v1 = vld [vmem:[%s2206_s2 + $0x18] sm:$0xf] }
  0x8c   : > { %1882 = vmatprep.subr.msk.mxu0 %vm260_vm1, %v253_v17 }
  0x8d   : > { %1883 = vmatpush1.msk.msra.mxu0 %vm260_vm1, %v252_v18 }
  0x8e   : > { %v567_v19 = vpop.permute.xlu1 %566  ;;  %1884 = vmatmul.mubr.msk.f32.vlgmr.msra.gmra.mxu0 %vm256_vm2, %v1881_v14  ;;  %1888 = vmatprep.subr.msk.mxu0 %vm260_vm1, %v2045_v5  ;;  %v571_v20 = vpop.permute.xlu0 %570 }
  0x8f   : > { %v578_v21 = vsel %vm576_vm3, %v569_v15, %v571_v20  ;;  %1889 = vmatpush1.msk.msra.mxu0 %vm260_vm1, %v2031_v2  ;;  %486 = vmatprep.mubr.f32.mxu0 %v1976_v0  ;;  %v577_v23 = vsel %vm576_vm3, %v567_v19, %v569_v15 }
  0x90   : > { %1895 = vmatprep.subr.msk.mxu0 %vm260_vm1, %v578_v21  ;;  %1893 = vmatmul.mubr.msk.f32.vlgmr.msra.gmra.mxu1 %vm256_vm2, %v238_v22  ;;  %v1936_v21 = vld [vmem:[%s2206_s2 + $0x20] sm:$0xf] }
  0x91   : > { %727 = vmatprep.mubr.f32.mxu1 %v1976_v0 }
  0x92   : > { %v575_v24 = vpop.permute.xlu1 %574  ;;  %1890 = vmatmul.mubr.msk.f32.vlgmr.msra.gmra.mxu0 %vm256_vm2, %v238_v22  ;;  %v573_v25 = vpop.permute.xlu0 %572 }
  0x93   : > { %1896 = vmatpush1.msk.msra.mxu0 %vm260_vm1, %v577_v23  ;;  %v579_v26 = vsel %vm576_vm3, %v571_v20, %v573_v25  ;;  %v580_v27 = vsel %vm576_vm3, %v573_v25, %v575_v24  ;;  %656 = vmatprep.mubr.f32.mxu0 %v1976_v0 }
  0x94   : > { %1898 = vmatprep.subr.msk.mxu1 %vm260_vm1, %v580_v27 }
  0x95   : > { %1899 = vmatpush1.msk.msra.mxu1 %vm260_vm1, %v579_v26 }
  0x96   : > { %v745_v29 = vpop.permute.xlu1 %744  ;;  %v743_v30 = vpop.permute.xlu0 %742  ;;  %1897 = vmatmul.mubr.msk.f32.vlgmr.msra.gmra.mxu0 %vm256_vm2, %v1894_v28  ;;  %1900 = vmatmul.mubr.msk.f32.vlgmr.msra.gmra.mxu1 %vm256_vm2, %v1894_v28 }
  0x97   : > { %v752_v31 = vsel %vm750_vm4, %v743_v30, %v745_v29  ;;  %830 = vmatprep.mubr.f32.mxu0 %v1976_v0  ;;  %901 = vmatprep.mubr.f32.mxu1 %v1976_v0 }
  0x98   : > { %1902 = vmatprep.subr.msk.mxu0 %vm260_vm1, %v752_v31 }
  0x9a   : > { %v747_v32 = vpop.permute.xlu1 %746  ;;  %v741_v33 = vpop.permute.xlu0 %740 }
  0x9b   : > { %v751_v35 = vsel %vm750_vm4, %v741_v33, %v743_v30  ;;  %v753_v39 = vsel %vm750_vm4, %v745_v29, %v747_v32 }
  0x9c   : > { %1903 = vmatpush1.msk.msra.mxu0 %vm260_vm1, %v751_v35 }
  0x9d   : > { %1904 = vmatmul.mubr.msk.f32.vlgmr.msra.gmra.mxu0 %vm256_vm2, %v1901_v34 }
  0x9e   : > { %v917_v36 = vpop.permute.xlu1 %916  ;;  %v749_v37 = vpop.permute.xlu0 %748  ;;  %1004 = vmatprep.mubr.f32.mxu0 %v1976_v0 }
  0x9f   : > { %v754_v38 = vsel %vm750_vm4, %v747_v32, %v749_v37 }
  0xa0   : > { %1905 = vmatprep.subr.msk.mxu1 %vm260_vm1, %v754_v38 }
  0xa1   : > { %1906 = vmatpush1.msk.msra.mxu1 %vm260_vm1, %v753_v39 }
  0xa2   : > { %v915_v40 = vpop.permute.xlu1 %914  ;;  %v919_v41 = vpop.permute.xlu0 %918  ;;  %1907 = vmatmul.mubr.msk.f32.vlgmr.msra.gmra.mxu1 %vm256_vm2, %v1901_v34 }
  0xa3   : > { %v925_v42 = vsel %vm924_vm5, %v915_v40, %v917_v36  ;;  %v926_v43 = vsel %vm924_vm5, %v917_v36, %v919_v41  ;;  %1075 = vmatprep.mubr.f32.mxu1 %v1976_v0 }
  0xa4   : > { %1909 = vmatprep.subr.msk.mxu0 %vm260_vm1, %v926_v43 }
  0xa5   : > { %1910 = vmatpush1.msk.msra.mxu0 %vm260_vm1, %v925_v42 }
  0xa6   : > { %v923_v45 = vpop.permute.xlu1 %922  ;;  %v921_v46 = vpop.permute.xlu0 %920  ;;  %1911 = vmatmul.mubr.msk.f32.vlgmr.msra.gmra.mxu0 %vm256_vm2, %v1908_v44 }
  0xa7   : > { %v927_v47 = vsel %vm924_vm5, %v919_v41, %v921_v46  ;;  %v928_v48 = vsel %vm924_vm5, %v921_v46, %v923_v45  ;;  %1178 = vmatprep.mubr.f32.mxu0 %v1976_v0 }
  0xa8   : > { %1912 = vmatprep.subr.msk.mxu1 %vm260_vm1, %v928_v48 }
  0xa9   : > { %1913 = vmatpush1.msk.msra.mxu1 %vm260_vm1, %v927_v47 }
  0xaa   : > { %v1093_v49 = vpop.permute.xlu1 %1092  ;;  %v1091_v50 = vpop.permute.xlu0 %1090  ;;  %1914 = vmatmul.mubr.msk.f32.vlgmr.msra.gmra.mxu1 %vm256_vm2, %v1908_v44 }
  0xab   : > { %v1100_v51 = vsel %vm1098_vm6, %v1091_v50, %v1093_v49  ;;  %1249 = vmatprep.mubr.f32.mxu1 %v1976_v0 }
  0xac   : > { %1916 = vmatprep.subr.msk.mxu0 %vm260_vm1, %v1100_v51 }
  0xae   : > { %v1095_v52 = vpop.permute.xlu1 %1094  ;;  %v1089_v53 = vpop.permute.xlu0 %1088 }
  0xaf   : > { %v1099_v55 = vsel %vm1098_vm6, %v1089_v53, %v1091_v50  ;;  %v1101_v59 = vsel %vm1098_vm6, %v1093_v49, %v1095_v52 }
  0xb0   : > { %1917 = vmatpush1.msk.msra.mxu0 %vm260_vm1, %v1099_v55 }
  0xb1   : > { %1918 = vmatmul.mubr.msk.f32.vlgmr.msra.gmra.mxu0 %vm256_vm2, %v1915_v54 }
  0xb2   : > { %v1265_v56 = vpop.permute.xlu1 %1264  ;;  %v1097_v57 = vpop.permute.xlu0 %1096  ;;  %1352 = vmatprep.mubr.f32.mxu0 %v1976_v0 }
  0xb3   : > { %v1102_v58 = vsel %vm1098_vm6, %v1095_v52, %v1097_v57 }
  0xb4   : > { %1919 = vmatprep.subr.msk.mxu1 %vm260_vm1, %v1102_v58 }
  0xb5   : > { %1920 = vmatpush1.msk.msra.mxu1 %vm260_vm1, %v1101_v59 }
  0xb6   : > { %v1263_v60 = vpop.permute.xlu1 %1262  ;;  %v1267_v61 = vpop.permute.xlu0 %1266  ;;  %1921 = vmatmul.mubr.msk.f32.vlgmr.msra.gmra.mxu1 %vm256_vm2, %v1915_v54 }
  0xb7   : > { %v1273_v62 = vsel %vm1272_vm7, %v1263_v60, %v1265_v56  ;;  %v1274_v63 = vsel %vm1272_vm7, %v1265_v56, %v1267_v61  ;;  %1423 = vmatprep.mubr.f32.mxu1 %v1976_v0 }
  0xb8   : > { %1923 = vmatprep.subr.msk.mxu0 %vm260_vm1, %v1274_v63 }
  0xb9   : > { %1924 = vmatpush1.msk.msra.mxu0 %vm260_vm1, %v1273_v62 }
  0xba   : > { %v1271_v2 = vpop.permute.xlu1 %1270  ;;  %v1269_v3 = vpop.permute.xlu0 %1268  ;;  %1925 = vmatmul.mubr.msk.f32.vlgmr.msra.gmra.mxu0 %vm256_vm2, %v1922_v1 }
  0xbb   : > { %v1275_v4 = vsel %vm1272_vm7, %v1267_v61, %v1269_v3  ;;  %v1276_v5 = vsel %vm1272_vm7, %v1269_v3, %v1271_v2  ;;  %1526 = vmatprep.mubr.f32.mxu0 %v1976_v0 }
  0xbc   : > { %1926 = vmatprep.subr.msk.mxu1 %vm260_vm1, %v1276_v5 }
  0xbd   : > { %1927 = vmatpush1.msk.msra.mxu1 %vm260_vm1, %v1275_v4 }
  0xbe   : > { %v1441_v6 = vpop.permute.xlu1 %1440  ;;  %1928 = vmatmul.mubr.msk.f32.vlgmr.msra.gmra.mxu1 %vm256_vm2, %v1922_v1  ;;  %v1439_v7 = vpop.permute.xlu0 %1438 }
  0xbf   : > { %v1448_v8 = vsel %vm1446_vm8, %v1439_v7, %v1441_v6  ;;  %1597 = vmatprep.mubr.f32.mxu1 %v1976_v0 }
  0xc0   : > { %1930 = vmatprep.subr.msk.mxu0 %vm260_vm1, %v1448_v8 }
  0xc2   : > { %v1443_v9 = vpop.permute.xlu1 %1442  ;;  %v1437_v10 = vpop.permute.xlu0 %1436 }
  0xc3   : > { %v1447_v12 = vsel %vm1446_vm8, %v1437_v10, %v1439_v7  ;;  %v1449_v16 = vsel %vm1446_vm8, %v1441_v6, %v1443_v9 }
  0xc4   : > { %1931 = vmatpush1.msk.msra.mxu0 %vm260_vm1, %v1447_v12 }
  0xc5   : > { %1932 = vmatmul.mubr.msk.f32.vlgmr.msra.gmra.mxu0 %vm256_vm2, %v1929_v11 }
  0xc6   : > { %v1613_v13 = vpop.permute.xlu1 %1612  ;;  %v1445_v14 = vpop.permute.xlu0 %1444  ;;  %1700 = vmatprep.mubr.f32.mxu0 %v1976_v0 }
  0xc7   : > { %v1450_v15 = vsel %vm1446_vm8, %v1443_v9, %v1445_v14 }
  0xc8   : > { %1933 = vmatprep.subr.msk.mxu1 %vm260_vm1, %v1450_v15 }
  0xc9   : > { %1934 = vmatpush1.msk.msra.mxu1 %vm260_vm1, %v1449_v16 }
  0xca   : > { %v1611_v17 = vpop.permute.xlu1 %1610  ;;  %1935 = vmatmul.mubr.msk.f32.vlgmr.msra.gmra.mxu1 %vm256_vm2, %v1929_v11  ;;  %v1615_v18 = vpop.permute.xlu0 %1614 }
  0xcb   : > { %v1621_v19 = vsel %vm1620_vm9, %v1611_v17, %v1613_v13  ;;  %v1622_v20 = vsel %vm1620_vm9, %v1613_v13, %v1615_v18  ;;  %1771 = vmatprep.mubr.f32.mxu1 %v1976_v0 }
  0xcc   : > { %1937 = vmatprep.subr.msk.mxu0 %vm260_vm1, %v1622_v20 }
  0xcd   : > { %1938 = vmatpush1.msk.msra.mxu0 %vm260_vm1, %v1621_v19 }
  0xce   : > { %v1619_v22 = vpop.permute.xlu1 %1618  ;;  %1939 = vmatmul.mubr.msk.f32.vlgmr.msra.gmra.mxu0 %vm256_vm2, %v1936_v21  ;;  %v1617_v23 = vpop.permute.xlu0 %1616 }
  0xcf   : > { %v1623_v24 = vsel %vm1620_vm9, %v1615_v18, %v1617_v23  ;;  %v1624_v25 = vsel %vm1620_vm9, %v1617_v23, %v1619_v22 }
  0xd0   : > { %1940 = vmatprep.subr.msk.mxu1 %vm260_vm1, %v1624_v25 }
  0xd1   : > { %1941 = vmatpush1.msk.msra.mxu1 %vm260_vm1, %v1623_v24 }
  0xd2   : > { %1942 = vmatmul.mubr.msk.f32.vlgmr.msra.gmra.mxu1 %vm256_vm2, %v1936_v21 }
  0xdb   : > { %v1786_v20 = vpop.permute.xlu0 %1785 }
 0x14a   : > { %v406_v28 = vpop.f32.mrf.mxu1 }
 0x14c   : > { %v408_v29 = vpop.f32.mrf.mxu1 }
 0x14e   : > { %v335_v26 = vpop.f32.mrf.mxu0 }
 0x150   : > { %v337_v27 = vpop.f32.mrf.mxu0  ;;  %v559_v31 = vpop.f32.mrf.mxu1 }
 0x151   : > { %v560_v49 = vadd.f32 %v559_v31, %v406_v28 }
 0x152   : > { %v488_v0 = vpop.f32.mrf.mxu0  ;;  %v561_v33 = vpop.f32.mrf.mxu1 }
 0x153   : > { %v489_v43 = vadd.f32 %v488_v0, %v335_v26  ;;  %v562_v52 = vadd.f32 %v561_v33, %v408_v29 }
 0x154   : > { %v490_v30 = vpop.f32.mrf.mxu0 }
 0x155   : > { %v491_v45 = vadd.f32 %v490_v30, %v337_v27 }
 0x156   : > { %v658_v32 = vpop.f32.mrf.mxu0  ;;  %v729_v35 = vpop.f32.mrf.mxu1 }
 0x157   : > { %v734_v47 = vadd.f32 %v658_v32, %v489_v43  ;;  %v736_v55 = vadd.f32 %v729_v35, %v560_v49 }
 0x158   : > { %v660_v34 = vpop.f32.mrf.mxu0  ;;  %v731_v37 = vpop.f32.mrf.mxu1 }
 0x159   : > { %v735_v50 = vadd.f32 %v660_v34, %v491_v45  ;;  %v737_v58 = vadd.f32 %v731_v37, %v562_v52 }
 0x15d   : > { %v832_v36 = vpop.f32.mrf.mxu0 }
 0x15e   : > { %v908_v53 = vadd.f32 %v832_v36, %v734_v47 }
 0x15f   : > { %v834_v38 = vpop.f32.mrf.mxu0 }
 0x160   : > { %v909_v56 = vadd.f32 %v834_v38, %v735_v50 }
 0x162   : > { %v903_v39 = vpop.f32.mrf.mxu1 }
 0x163   : > { %v910_v61 = vadd.f32 %v903_v39, %v736_v55 }
 0x164   : > { %v905_v41 = vpop.f32.mrf.mxu1 }
 0x165   : > { %v911_v2 = vadd.f32 %v905_v41, %v737_v58 }
 0x166   : > { %v1006_v40 = vpop.f32.mrf.mxu0 }
 0x167   : > { %v1082_v59 = vadd.f32 %v1006_v40, %v908_v53 }
 0x168   : > { %v1008_v42 = vpop.f32.mrf.mxu0 }
 0x169   : > { %v1083_v62 = vadd.f32 %v1008_v42, %v909_v56 }
 0x16a   : > { %v1077_v44 = vpop.f32.mrf.mxu1 }
 0x16b   : > { %v1084_v5 = vadd.f32 %v1077_v44, %v910_v61 }
 0x16c   : > { %v1079_v48 = vpop.f32.mrf.mxu1 }
 0x16d   : > { %v1085_v8 = vadd.f32 %v1079_v48, %v911_v2 }
 0x171   : > { %v1180_v46 = vpop.f32.mrf.mxu0 }
 0x172   : > { %v1256_v3 = vadd.f32 %v1180_v46, %v1082_v59 }
 0x173   : > { %v1182_v51 = vpop.f32.mrf.mxu0 }
 0x174   : > { %v1257_v6 = vadd.f32 %v1182_v51, %v1083_v62 }
 0x176   : > { %v1251_v54 = vpop.f32.mrf.mxu1 }
 0x177   : > { %v1258_v12 = vadd.f32 %v1251_v54, %v1084_v5 }
 0x178   : > { %v1253_v60 = vpop.f32.mrf.mxu1 }
 0x179   : > { %v1259_v16 = vadd.f32 %v1253_v60, %v1085_v8 }
 0x17a   : > { %v1354_v57 = vpop.f32.mrf.mxu0 }
 0x17b   : > { %v1430_v9 = vadd.f32 %v1354_v57, %v1256_v3 }
 0x17c   : > { %v1356_v63 = vpop.f32.mrf.mxu0 }
 0x17d   : > { %v1431_v13 = vadd.f32 %v1356_v63, %v1257_v6 }
 0x17e   : > { %v1425_v1 = vpop.f32.mrf.mxu1 }
 0x17f   : > { %v1432_v17 = vadd.f32 %v1425_v1, %v1258_v12 }
 0x180   : > { %v1427_v7 = vpop.f32.mrf.mxu1 }
 0x181   : > { %v1433_v23 = vadd.f32 %v1427_v7, %v1259_v16 }
 0x185   : > { %v1528_v4 = vpop.f32.mrf.mxu0 }
 0x186   : > { %v1604_v14 = vadd.f32 %v1528_v4, %v1430_v9 }
 0x187   : > { %v1530_v10 = vpop.f32.mrf.mxu0 }
 0x188   : > { %v1605_v18 = vadd.f32 %v1530_v10, %v1431_v13 }
 0x18a   : > { %v1599_v11 = vpop.f32.mrf.mxu1 }
 0x18b   : > { %v1606_v24 = vadd.f32 %v1599_v11, %v1432_v17 }
 0x18c   : > { %v1601_v21 = vpop.f32.mrf.mxu1 }
 0x18d   : > { %v1607_v27 = vadd.f32 %v1601_v21, %v1433_v23 }
 0x18e   : > { %v1702_v15 = vpop.f32.mrf.mxu0 }
 0x18f   : > { %v1778_v19 = vadd.f32 %v1702_v15, %v1604_v14 }
 0x190   : > { %v1704_v22 = vpop.f32.mrf.mxu0 }
 0x191   : > { %v1779_v25 = vadd.f32 %v1704_v22, %v1605_v18  ;;  %v1788_v28 = vadd.f32 %v1786_v20, %v1778_v19 }
 0x192   : > { %v1773_v26 = vpop.f32.mrf.mxu1 }
 0x193   : > { %v1789_v0 = vadd.f32 %v1786_v20, %v1779_v25  ;;  %v1780_v29 = vadd.f32 %v1773_v26, %v1606_v24 }
 0x194   : > { %v1775_v30 = vpop.f32.mrf.mxu1 }
 0x195   : > { %v1796_v31 = vcombine.low %v1788_v28, %v1789_v0  ;;  %v1781_v32 = vadd.f32 %v1775_v30, %v1607_v27  ;;  %v1790_v33 = vadd.f32 %v1786_v20, %v1780_v29 }
 0x197   : > { %1800 = vst [vmem:[%s228_s9] sm:$0xff] %v1796_v31  ;;  %v1791_v34 = vadd.f32 %v1786_v20, %v1781_v32 }
 0x199   : > { %v1797_v35 = vcombine.low %v1790_v33, %v1791_v34 }
 0x19b   : > { %1801 = vst [vmem:[%s228_s9 + $0x8] sm:$0xff] %v1797_v35 }
 0x19c PF: > { %s14_s15 = sadd.s32 1, %s1974_s15  }
 0x19d   : > { %p11_p6 = scmp.ge.s32.totalorder %s14_s15, 4  }
 0x19f   :  { %13 = sbr.rel (!%p11_p6) target bundleno = 1 (0x1), region = 77 }

</bundles_post_ra>
